<compile_context>
chip_gen: v7x
topology: tpu7x:2x2x1
jax: 0.10.0
libtpu: 0.0.40
codegen_flags: <defaults>
</compile_context>

<pallas_src>
import math

import numpy as np
import jax
import jax.numpy as jnp
from jax import lax
from jax.experimental import pallas as pl
from jax.experimental.pallas import tpu as pltpu


# ------------------------------ Pallas kernel ------------------------------

_INV_SQRT2 = 1.0 / math.sqrt(2.0)


def geglu_kernel(x_ref, w0_ref, w1_ref, o_ref):
    # x_ref : (block_tokens, C)      bf16
    # w0_ref: (C, block_ffn)         bf16   (gate projection columns)
    # w1_ref: (C, block_ffn)         bf16   (linear projection columns)
    # o_ref : (block_tokens, block_ffn)
    x = x_ref[...]
    gate = jnp.dot(x, w0_ref[...], preferred_element_type=jnp.float32)
    lin = jnp.dot(x, w1_ref[...], preferred_element_type=jnp.float32)
    # torch nn.GELU() default = exact erf formulation (computed in f32).
    gate = 0.5 * gate * (1.0 + lax.erf(gate * _INV_SQRT2))
    o_ref[...] = (gate * lin).astype(o_ref.dtype)


# -------------------------------- wrapper ----------------------------------

def geglu(x, w0, w1, *, block_tokens=256, block_ffn=512, out_dtype=jnp.float32):
    """x: (..., C).  w0, w1: torch-layout (Fd, C) Linear weights (no bias)."""
    C = x.shape[-1]
    Fd = w0.shape[0]
    assert w0.shape == (Fd, C) and w1.shape == (Fd, C)
    # Lane-density constraints for this kernel.
    assert C % 128 == 0 and Fd % 128 == 0

    lead_shape = x.shape[:-1]
    # bf16 in the wrapper: halves the x DMA bytes; matches reference numerics.
    xf = x.reshape(-1, C).astype(jnp.bfloat16)
    n = xf.shape[0]

    # Legalize tile sizes against the actual problem size.
    block_tokens = int(max(8, min(block_tokens, pl.cdiv(n, 8) * 8)))
    assert block_tokens % 8 == 0
    block_ffn = int(min(block_ffn, Fd))
    block_ffn = (block_ffn // 128) * 128
    while Fd % block_ffn != 0:          # terminates: 128 always divides Fd
        block_ffn -= 128

    n_pad = pl.cdiv(n, block_tokens) * block_tokens
    if n_pad != n:
        # TODO(synk): replace this (cold-path) pad with a masked store on the
        # final token tile to avoid an extra HBM pass for very long ragged inputs.
        xf = jnp.pad(xf, ((0, n_pad - n), (0, 0)))

    # Separate gate / linear weight halves, transposed to (C, Fd), bf16.
    w0t = w0.T.astype(jnp.bfloat16)
    w1t = w1.T.astype(jnp.bfloat16)

    # ffn tiles OUTER (weights loaded once, resident across inner token loop),
    # token tiles INNER (x streams).
    grid = (Fd // block_ffn, n_pad // block_tokens)

    # Accurate VMEM budget: double-buffered x / w0 / w1 / out tiles + f32
    # gate/lin intermediates + compiler scratch headroom, clamped to physical VMEM.
    out_itemsize = np.dtype(out_dtype).itemsize
    x_b = 2 * block_tokens * C * 2
    w_b = 2 * 2 * C * block_ffn * 2
    o_b = 2 * block_tokens * block_ffn * out_itemsize
    inter_b = 3 * block_tokens * block_ffn * 4
    vmem_budget = x_b + w_b + o_b + inter_b + (4 << 20)
    vmem_budget = max(vmem_budget, 32 << 20)
    try:
        cap = int(pltpu.get_tpu_info().vmem_capacity_bytes)
    except Exception:
        cap = 64 << 20
    vmem_budget = int(min(vmem_budget, cap))

    out = pl.pallas_call(
        geglu_kernel,
        out_shape=jax.ShapeDtypeStruct((n_pad, Fd), out_dtype),
        grid_spec=pltpu.PrefetchScalarGridSpec(
            num_scalar_prefetch=0,
            grid=grid,
            in_specs=[
                # x tile: varies with inner (token) axis only.
                pl.BlockSpec((block_tokens, C), lambda j, i: (i, 0)),
                # weight tiles: vary with outer (ffn) axis only -> DMA'd once per j.
                pl.BlockSpec((C, block_ffn), lambda j, i: (0, j)),
                pl.BlockSpec((C, block_ffn), lambda j, i: (0, j)),
            ],
            out_specs=pl.BlockSpec((block_tokens, block_ffn), lambda j, i: (i, j)),
        ),
        compiler_params=pltpu.CompilerParams(
            dimension_semantics=("parallel", "parallel"),  # independent output tiles
            vmem_limit_bytes=vmem_budget,
        ),
    )(xf, w0t, w1t)

    if n_pad != n:
        out = out[:n]
    return out.reshape(*lead_shape, Fd)


# --------------------------- pure-JAX reference -----------------------------

def reference(x, w0, w1):
    """Same numerics as the kernel: bf16 operands, f32 accumulation, exact GELU."""
    C = x.shape[-1]
    Fd = w0.shape[0]
    xb = x.reshape(-1, C).astype(jnp.bfloat16)
    gate = jnp.dot(xb, w0.T.astype(jnp.bfloat16), preferred_element_type=jnp.float32)
    lin = jnp.dot(xb, w1.T.astype(jnp.bfloat16), preferred_element_type=jnp.float32)
    out = jax.nn.gelu(gate, approximate=False) * lin
    return out.reshape(*x.shape[:-1], Fd)


# ----------------------------------- main -----------------------------------

if __name__ == "__main__":
    # Small but lane-dense config (C, Fd multiples of 128).
    B, L = 2, 64
    embed_dim, ffn_dim = 256, 512

    key = jax.random.PRNGKey(0)
    kx, k0, k1 = jax.random.split(key, 3)
    x = jax.random.normal(kx, (B, L, embed_dim), jnp.float32)
    w0 = (0.02 * jax.random.normal(k0, (ffn_dim, embed_dim))).astype(jnp.float32)
    w1 = (0.02 * jax.random.normal(k1, (ffn_dim, embed_dim))).astype(jnp.float32)

    ref = reference(x, w0, w1)

    # Exercise the 2-D tiling (grid = (2 ffn tiles, 2 token tiles)).
    out = geglu(x, w0, w1, block_tokens=64, block_ffn=256)
    out = jax.block_until_ready(out)
    assert out.shape == (B, L, ffn_dim)
    max_err = float(jnp.max(jnp.abs(out - ref)))
    assert max_err < 5e-3, max_err

    # Also run with default (clamped) tile sizes -> grid = (1, 1).
    out2 = jax.block_until_ready(geglu(x, w0, w1))
    max_err2 = float(jnp.max(jnp.abs(out2 - ref)))
    assert max_err2 < 5e-3, max_err2

    print("KERNEL_OK")
</pallas_src>

<mosaic_0001>
module attributes {stable_mosaic.version = 11 : i64} {
  func.func @geglu_kernel(%arg0: i32, %arg1: i32, %arg2: memref<64x256xbf16, #tpu.memory_space<vmem>>, %arg3: memref<256x256xbf16, #tpu.memory_space<vmem>>, %arg4: memref<256x256xbf16, #tpu.memory_space<vmem>>, %arg5: memref<64x256xf32, #tpu.memory_space<vmem>>) attributes {dimension_semantics = [#tpu.dimension_semantics<parallel>, #tpu.dimension_semantics<parallel>], iteration_bounds = array<i64: 2, 2>, scalar_prefetch = 0 : i64, scratch_operands = 0 : i64, tpu.core_type = #tpu.core_type<tc>, window_params = [{transform_indices = @transform_0, window_bounds = array<i64: 64, 256>}, {transform_indices = @transform_1, window_bounds = array<i64: 256, 256>}, {transform_indices = @transform_2, window_bounds = array<i64: 256, 256>}, {transform_indices = @transform_3, window_bounds = array<i64: 64, 256>}]} {
    %c0 = arith.constant 0 : index
    %c0_0 = arith.constant 0 : index
    %0 = vector.load %arg2[%c0, %c0_0] : memref<64x256xbf16, #tpu.memory_space<vmem>>, vector<64x256xbf16>
    %c0_1 = arith.constant 0 : index
    %c0_2 = arith.constant 0 : index
    %1 = vector.load %arg3[%c0_1, %c0_2] : memref<256x256xbf16, #tpu.memory_space<vmem>>, vector<256x256xbf16>
    %cst = arith.constant dense<0.000000e+00> : vector<64x256xf32>
    %2 = tpu.matmul %0, %1, %cst {dimension_numbers = #tpu.dot_dimension_numbers<[1], [0], [0], [1], [0, 0, 1, 1], [], []>} : vector<64x256xbf16>, vector<256x256xbf16>, vector<64x256xf32> -> vector<64x256xf32>
    %c0_3 = arith.constant 0 : index
    %c0_4 = arith.constant 0 : index
    %3 = vector.load %arg4[%c0_3, %c0_4] : memref<256x256xbf16, #tpu.memory_space<vmem>>, vector<256x256xbf16>
    %cst_5 = arith.constant dense<0.000000e+00> : vector<64x256xf32>
    %4 = tpu.matmul %0, %3, %cst_5 {dimension_numbers = #tpu.dot_dimension_numbers<[1], [0], [0], [1], [0, 0, 1, 1], [], []>} : vector<64x256xbf16>, vector<256x256xbf16>, vector<64x256xf32> -> vector<64x256xf32>
    %cst_6 = arith.constant 5.000000e-01 : f32
    %5 = vector.broadcast %cst_6 : f32 to vector<64x256xf32>
    %6 = arith.mulf %5, %2 : vector<64x256xf32>
    %cst_7 = arith.constant 0.707106769 : f32
    %7 = vector.broadcast %cst_7 : f32 to vector<64x256xf32>
    %8 = arith.mulf %2, %7 : vector<64x256xf32>
    %9 = math.erf %8 : vector<64x256xf32>
    %cst_8 = arith.constant 1.000000e+00 : f32
    %10 = vector.broadcast %cst_8 : f32 to vector<64x256xf32>
    %11 = arith.addf %10, %9 : vector<64x256xf32>
    %12 = arith.mulf %6, %11 : vector<64x256xf32>
    %13 = arith.mulf %12, %4 : vector<64x256xf32>
    %c0_9 = arith.constant 0 : index
    %c0_10 = arith.constant 0 : index
    %14 = vector.load %arg5[%c0_9, %c0_10] : memref<64x256xf32, #tpu.memory_space<vmem>>, vector<64x256xf32>
    tpu.vector_store %arg5[%c0_9, %c0_10], %13 {strides = array<i32>} : memref<64x256xf32, #tpu.memory_space<vmem>>, vector<64x256xf32>,
    return
  }
  func.func @transform_0(%arg0: i32, %arg1: i32) -> (i32, i32) {
    %c0_i32 = arith.constant 0 : i32
    %c0_i32_0 = arith.constant 0 : i32
    return %arg1, %c0_i32 : i32, i32
  }
  func.func @transform_1(%arg0: i32, %arg1: i32) -> (i32, i32) {
    %c0_i32 = arith.constant 0 : i32
    %c0_i32_0 = arith.constant 0 : i32
    return %c0_i32, %arg0 : i32, i32
  }
  func.func @transform_2(%arg0: i32, %arg1: i32) -> (i32, i32) {
    %c0_i32 = arith.constant 0 : i32
    %c0_i32_0 = arith.constant 0 : i32
    return %c0_i32, %arg0 : i32, i32
  }
  func.func @transform_3(%arg0: i32, %arg1: i32) -> (i32, i32) {
    %c0_i32 = arith.constant 0 : i32
    return %arg1, %arg0 : i32, i32
  }
}

</mosaic_0001>

<bundles_post_ra>
// kernel: tpu_custom_call.1
= control target key start
LH: loop header
LB: loop body
LE: loop exit
PB: predicated region body
PF: predicated region fallthrough
CT: control target
= control target key end

     0   :  { %s2286_s0 = inlined_call_operand.hbm [shape: bf16[128,256], index: 0, kind: input, shape index: {}]   ;;  %s2287_s1 = inlined_call_operand.hbm [shape: bf16[256,512], index: 1, kind: input, shape index: {}]   ;;  %s2288_s2 = inlined_call_operand.hbm [shape: bf16[256,512], index: 2, kind: input, shape index: {}]   ;;  %s2289_s3 = inlined_call_operand.hbm [shape: f32[128,512], index: 3, kind: output, shape index: {}]  }
   0x1   :  { %2307 = sst [smem:[#allocation21_spill]] %s2287_s1 }
   0x2   :  { %2308 = sst [smem:[#allocation22_spill]] %s2289_s3 }
   0x3   :  { %8 = vsyncpa [#allocation3], 0 }
   0x4   :  { %10 = vsyncpa [#allocation3 + $0x1], 0 }
   0x5   :  { %11 = vsyncpa [#allocation6], 0 }
   0x6   :  { %13 = vsyncpa [#allocation6 + $0x1], 0 }
   0x7   :  { %14 = vsyncpa [#allocation4], 0 }
   0x8   :  { %16 = vsyncpa [#allocation4 + $0x1], 0  ;;  %s1780_s12 = smov 0   ;;  %s1782_s13 = smov 0  }
   0x9   :  { %s1784_s14 = smov 0   ;;  %s1786_s15 = smov 0  }
   0xa   :  { %s1788_s16 = smov 0   ;;  %s1790_s17 = smov 0  }
   0xb   :  { %s1792_s18 = smov 0   ;;  %s1794_s19 = smov 0  }
   0xc   :  { %s1796_s20 = smov 0   ;;  %s1798_s21 = smov 0  }
   0xd   :  { %s1800_s22 = smov 0   ;;  %s1802_s23 = smov 0  }
   0xe   :  { %s1804_s24 = smov 0   ;;  %s1806_s25 = smov 0  }
   0xf LB: > { %2309 = sst [smem:[#allocation12_spill]] %s1732_s21  ;;  %p49_p0 = scmp.eq.s32.totalorder %s1748_s25, 0  ;;  %s1748_s25 = sphi %s1806_s25, %s22_s25   ;;  %s1744_s24 = sphi %s1804_s24, %s2351_s24   ;;  %s1740_s23 = sphi %s1802_s23, %s2350_s23   ;;  %s1736_s22 = sphi %s1800_s22, %s2349_s22   ;;  %s1732_s21 = sphi %s1798_s21, %s2348_s21   ;;  %s1728_s20 = sphi %s1796_s20, %s2360_s20   ;;  %s1724_s19 = sphi %s1794_s19, %s2359_s19   ;;  %s1720_s18 = sphi %s1792_s18, %s2358_s18   ;;  %s1716_s17 = sphi %s1790_s17, %s2357_s17   ;;  %s1712_s16 = sphi %s1788_s16, %s2356_s16   ;;  %s1708_s15 = sphi %s1786_s15, %s2355_s15   ;;  %s1704_s14 = sphi %s1784_s14, %s2354_s14   ;;  %s1700_s13 = sphi %s1782_s13, %s2353_s13   ;;  %s1696_s12 = sphi %s1780_s12, %s2352_s12  }
  0x10   : > { %2310 = sst [smem:[#allocation13_spill]] %s1736_s22  ;;  %p74_p1 = scmp.ne.s32.totalorder %s1716_s17, %s1712_s16 }
  0x11   : > { %2311 = sst [smem:[#allocation14_spill]] %s1740_s23  ;;  %p2290_p3 = scmp.lt.s32.totalorder %s1748_s25, 4 }
  0x12   : > { %2312 = sst [smem:[#allocation15_spill]] %s1744_s24  ;;  %p76_p2 = por %p74_p1, %p49_p0 }
  0x13   : > { %s180_s28 = sand.u32 1, %s1748_s25   ;;  %s182_s29 = sand.u32 1, %s1716_s17  }
  0x14   : > { %s1860_s30 = sshll.u32 %s182_s29, 8  ;;  %s1223_s4 = sshll.u32 %s1744_s24, 7 }
  0x15   : > { %s2313_s1 = sld [smem:[#allocation21_spill]]  ;;  %s184_s8 = scalar_lea.vmem [#allocation5], %s1860_s30 }
  0x16   : > { %s191_s9 = sshll.u32 %s184_s8, 4  ;;  %p1875_p4 = pnand %p2290_p3, %p76_p2  ;;  %s1871_s9 = int_to_ptr.vmem [resolvable:$true] %s191_s9 }
  0x17   : > { %s1881_s11 = scalar_lea.sflag [#allocation6], %s180_s28 }
  0x18   : > { %p2298_p7 = pneg %p1875_p4 }
  0x1b   : > { %s1868_s7 = scalar_lea.hbm %s2313_s1, %s1223_s4  ;;  %s1513_s8 = scalar_lea.hbm %s2313_s1, 8192 }
  0x1c   : > { %s1508_s29 = scalar_lea.hbm %s1868_s7, 4096  ;;  %p1514_p10 = scmp.lt.u32.totalorder %s1868_s7, %s2313_s1 }
  0x1d   : > { %p1509_p6 = scmp.ne.s32.totalorder %s1868_s7, %s1508_s29  ;;  %p1515_p11 = scmp.lt.u32.totalorder %s1513_s8, %s1508_s29 }
  0x1e   : > { %p1517_p13 = scmp.lt.u32.totalorder %s1508_s29, %s1868_s7 }
  0x1f   : > { %p1511_p8 = pnand %p2298_p7, %p1509_p6  ;;  %p1516_p12 = por %p1515_p11, %p1514_p10 }
  0x21   : > { %p1512_p9 = pneg %p1511_p8  ;;  %p1518_p1 = por %p1517_p13, %p1516_p12 }
  0x23   : > { %p1519_p2 = pnand %p1518_p1, %p1512_p9 }
  0x25   : > { %1522 = shalt.err (!%p1519_p2)
}
  0x26   : > { %s1523_s28 = scalar_lea.vmem %s1871_s9, 4096  ;;  %s1750_s5 = smov [#allocation5]  }
  0x27   : > { %p1524_p6 = scmp.ne.s32.totalorder %s1871_s9, %s1523_s28  ;;  %s1528_s6 = sshll.u32 %s1750_s5, 4  ;;  %s1529_s6 = int_to_ptr.vmem [resolvable:$false] %s1528_s6 }
  0x28   : > { %s1530_s26 = scalar_lea.vmem %s1529_s6, 8192  ;;  %p1531_p5 = scmp.lt.s32.totalorder %s1871_s9, %s1529_s6 }
  0x29   : > { %p1526_p8 = pnand %p1524_p6, %p2298_p7  ;;  %p1532_p10 = scmp.lt.s32.totalorder %s1530_s26, %s1523_s28 }
  0x2b   : > { %p1527_p3 = pneg %p1526_p8  ;;  %p1533_p11 = por %p1532_p10, %p1531_p5 }
  0x2d   : > { %p1534_p12 = pnand %p1533_p11, %p1527_p3 }
  0x2f   : > { %1537 = shalt.err (!%p1534_p12)
}
  0x30   : > { %s2292_s27 = smov 256   ;;  %s2293_s29 = smov 128  }
  0x31   : > { %s2295_s8 = smov 8   ;;  %s1917_s6 = scalar_lea.hbm %s2288_s2, %s1223_s4 }
  0x32   : > { %1240 = dma.hbm_to_vmem [thread:$0]  (!%p1875_p4), %s1868_s7, 4096, %s1871_s9, %s1881_s11, %s2292_s27, %s2293_s29, %s2295_s8  }
  0x33   : > { %p1137_p3 = scmp.ge.s32.totalorder %s1748_s25, 1  ;;  %s205_s26 = scalar_lea.vmem [#allocation7], %s1860_s30 }
  0x34   : > { %s1921_s1 = sshll.u32 %s205_s26, 4  ;;  %p220_p5 = scmp.lt.s32.totalorder %s1748_s25, 5  ;;  %s2008_s1 = int_to_ptr.vmem [resolvable:$true] %s1921_s1 }
  0x35   : > { %s1929_s21 = sadd.s32 4294967295, %s1748_s25   ;;  %s1124_s7 = sadd.s32 4294967294, %s1748_s25  }
  0x36   : > { %p1924_p9 = pnand %p1137_p3, %p220_p5  ;;  %s31_s9 = sadd.s32 1, %s1740_s23 }
  0x37   : > { %p32_p13 = scmp.ge.s32.totalorder %s31_s9, 2  ;;  %s41_s4 = sadd.s32 1, %s1728_s20 }
  0x38   : > { %s2315_s3 = scalar_select %p1924_p9, 1, 0 }
  0x39   : > { %p48_p1 = scmp.ne.s32.totalorder %s1728_s20, %s1724_s19  ;;  %p54_p2 = scmp.ne.s32.totalorder %s1724_s19, %s1720_s18 }
  0x3a   : > { %s2362_s9 = smov (%p32_p13, %s31_s9), 0  ;;  %s2317_s30 = sadd.s32 1, %s1744_s24 }
  0x3b   : > { %2316 = sst [smem:[#allocation16_spill]] %s2362_s9  ;;  %s2364_s30 = smov (!%p32_p13, %s2317_s30), %s1744_s24 }
  0x3c   : > { %s38_s28 = ssub.s32 %s1740_s23, %s2362_s9  ;;  %p1947_p6 = por %p49_p0, %p48_p1 }
  0x3d   : > { %p36_p8 = scmp.ge.s32.totalorder %s2364_s30, 2  ;;  %p39_p10 = scmp.eq.s32.totalorder %s38_s28, 0 }
  0x3e   : > { %p55_p11 = scmp.eq.s32.totalorder %s1929_s21, 0  ;;  %s121_s18 = sadd.s32 1, %s1704_s14 }
  0x3f   : > { %s2366_s30 = smov (%p36_p8, %s2364_s30), 0  ;;  %p2322_p3 = scmp.ne.s32.totalorder %s1712_s16, %s1708_s15 }
  0x40   : > { %2319 = sst [smem:[#allocation17_spill]] %s2366_s30  ;;  %p1958_p12 = por %p55_p11, %p54_p2 }
  0x41   : > { %s1956_s26 = scalar_select %p39_p10, %s1728_s20, %s41_s4  }
  0x42   : > { %s2321_s27 = scalar_select %p1958_p12, 1, 0 }
  0x43   : > { %2320 = sst [smem:[#allocation18_spill]] %s1956_s26  ;;  %s64_s29 = ssub.s32 %s1744_s24, %s2366_s30 }
  0x44   : > { %p65_p0 = scmp.eq.s32.totalorder %s64_s29, 0  ;;  %p1967_p5 = por %p2322_p3, %p55_p11 }
  0x45   : > { %s118_s9 = sor.u32 %s64_s29, %s38_s28  ;;  %p131_p13 = scmp.ne.s32.totalorder %s1704_s14, %s1700_s13 }
  0x46   : > { %s2323_s8 = scalar_select %p1967_p5, 1, 0 }
  0x47   : > { %s2325_s22 = sadd.s32 1, %s1716_s17  ;;  %p119_p1 = scmp.eq.s32.totalorder %s118_s9, 0 }
  0x48   : > { %2324 = sst [smem:[#allocation19_spill]] %s2323_s8  ;;  %p132_p2 = scmp.eq.s32.totalorder %s1929_s21, 3 }
  0x49   : > { %s1976_s4 = scalar_select %p65_p0, %s1716_s17, %s2325_s22  }
  0x4a   : > { %p137_p8 = scmp.ne.s32.totalorder %s1700_s13, %s1696_s12  ;;  %p138_p10 = scmp.eq.s32.totalorder %s1124_s7, 3 }
  0x4b   : > { %2326 = sst [smem:[#allocation20_spill]] %s1976_s4  ;;  %p1984_p7 = por %p132_p2, %p131_p13 }
  0x4c   : > { %s1982_s26 = scalar_select %p119_p1, %s1704_s14, %s121_s18  }
  0x4d   : > { %s2327_s15 = scalar_select %p1984_p7, 1, 0 }
  0x4e   : > { %p1988_p11 = por %p138_p10, %p137_p8  ;;  %s158_s29 = sand.u32 1, %s1728_s20  }
  0x4f   : > { %s1222_s28 = sshll.u32 %s1740_s23, 10  ;;  %s1127_s24 = sshll.u32 %s158_s29, 6 }
  0x50   : > { %s2328_s30 = scalar_select %p1988_p11, 1, 0 }
  0x51   : > { %s1997_s9 = scalar_lea.hbm %s2286_s0, %s1222_s28  ;;  %s162_s7 = scalar_lea.vmem [#allocation2], %s1127_s24 }
  0x52   : > { %s170_s18 = sshll.u32 %s162_s7, 4  ;;  %p2329_p0 = scmp.lt.s32.totalorder %s1748_s25, 4  ;;  %s2010_s18 = int_to_ptr.vmem [resolvable:$true] %s170_s18 }
  0x53   : > { %s2012_s8 = scalar_lea.sflag [#allocation3], %s158_s29  ;;  %s1538_s28 = scalar_lea.hbm %s1997_s9, 1024 }
  0x54   : > { %p2003_p3 = pnand %p2329_p0, %p1947_p6  ;;  %p1539_p13 = scmp.ne.s32.totalorder %s1997_s9, %s1538_s28 }
  0x55   : > { %s1543_s22 = scalar_lea.hbm %s2286_s0, 2048  ;;  %p1544_p6 = scmp.lt.u32.totalorder %s1997_s9, %s2286_s0 }
  0x56   : > { %p1540_p1 = pneg %p2003_p3  ;;  %p1545_p10 = scmp.lt.u32.totalorder %s1543_s22, %s1538_s28 }
  0x57   : > { %p1547_p11 = scmp.lt.u32.totalorder %s1538_s28, %s1997_s9 }
  0x58   : > { %p1541_p2 = pnand %p1540_p1, %p1539_p13  ;;  %p1546_p0 = por %p1545_p10, %p1544_p6 }
  0x5a   : > { %p1542_p8 = pneg %p1541_p2  ;;  %p1548_p7 = por %p1547_p11, %p1546_p0 }
  0x5c   : > { %p1549_p5 = pnand %p1548_p7, %p1542_p8 }
  0x5e   : > { %1552 = shalt.err (!%p1549_p5)
}
  0x5f   : > { %s1553_s29 = scalar_lea.vmem %s2010_s18, 1024  ;;  %s1754_s24 = smov [#allocation2]  }
  0x60   : > { %p1554_p13 = scmp.ne.s32.totalorder %s2010_s18, %s1553_s29  ;;  %s1558_s5 = sshll.u32 %s1754_s24, 4  ;;  %s1559_s5 = int_to_ptr.vmem [resolvable:$false] %s1558_s5 }
  0x61   : > { %s1560_s23 = scalar_lea.vmem %s1559_s5, 2048  ;;  %p1561_p9 = scmp.lt.s32.totalorder %s2010_s18, %s1559_s5 }
  0x62   : > { %p1556_p2 = pnand %p1554_p13, %p1540_p1  ;;  %p1562_p6 = scmp.lt.s32.totalorder %s1560_s23, %s1553_s29 }
  0x64   : > { %p1557_p12 = pneg %p1556_p2  ;;  %p1563_p10 = por %p1562_p6, %p1561_p9 }
  0x66   : > { %p1564_p11 = pnand %p1563_p10, %p1557_p12 }
  0x68   : > { %1567 = shalt.err (!%p1564_p11)
}
  0x69   : > { %s2331_s28 = smov 8   ;;  %s2332_s22 = smov 128  }
  0x6a   : > { %1237 = dma.hbm_to_vmem [thread:$0]  (!%p2003_p3), %s1997_s9, 1024, %s2010_s18, %s2012_s8, %s2332_s22, %s2332_s22, %s2331_s28  }
  0x6b   : > { %s1568_s7 = scalar_lea.hbm %s1917_s6, 4096  ;;  %p2333_p9 = pneg %p1875_p4 }
  0x6c   : > { %p1569_p7 = scmp.ne.s32.totalorder %s1917_s6, %s1568_s7  ;;  %s1573_s24 = scalar_lea.hbm %s2288_s2, 8192 }
  0x6d   : > { %p1574_p1 = scmp.lt.u32.totalorder %s1917_s6, %s2288_s2  ;;  %p1575_p8 = scmp.lt.u32.totalorder %s1573_s24, %s1568_s7 }
  0x6e   : > { %p1571_p12 = pnand %p1569_p7, %p2333_p9  ;;  %p1577_p13 = scmp.lt.u32.totalorder %s1568_s7, %s1917_s6 }
  0x6f   : > { %p1576_p0 = por %p1575_p8, %p1574_p1 }
  0x70   : > { %p1572_p5 = pneg %p1571_p12 }
  0x71   : > { %p1578_p2 = por %p1577_p13, %p1576_p0 }
  0x73   : > { %p1579_p6 = pnand %p1578_p2, %p1572_p5 }
  0x75   : > { %1582 = shalt.err (!%p1579_p6)
}
  0x76   : > { %s1583_s9 = scalar_lea.vmem %s2008_s1, 4096  ;;  %p2334_p10 = pmov %p2333_p9 }
  0x77   : > { %p1584_p3 = scmp.ne.s32.totalorder %s2008_s1, %s1583_s9  ;;  %s1755_s18 = smov [#allocation7]  }
  0x78   : > { %s1588_s8 = sshll.u32 %s1755_s18, 4  ;;  %s1589_s8 = int_to_ptr.vmem [resolvable:$false] %s1588_s8 }
  0x79   : > { %p1586_p11 = pnand %p1584_p3, %p2334_p10  ;;  %s1590_s29 = scalar_lea.vmem %s1589_s8, 8192 }
  0x7a   : > { %p1591_p9 = scmp.lt.s32.totalorder %s2008_s1, %s1589_s8  ;;  %p1592_p12 = scmp.lt.s32.totalorder %s1590_s29, %s1583_s9 }
  0x7b   : > { %p1587_p7 = pneg %p1586_p11 }
  0x7c   : > { %p1593_p1 = por %p1592_p12, %p1591_p9 }
  0x7e   : > { %p1594_p8 = pnand %p1593_p1, %p1587_p7 }
  0x80   : > { %1597 = shalt.err (!%p1594_p8)
}
  0x81   : > { %s2335_s7 = smov 256   ;;  %p2336_p5 = scmp.ne.s32.totalorder %s2315_s3, 0 }
  0x82   : > { %1243 = dma.hbm_to_vmem [thread:$0]  (!%p1875_p4), %s1917_s6, 4096, %s2008_s1, %s1881_s11, %s2335_s7, %s2332_s22, %s2331_s28  }
  0x83   : > { %224 = sbr.rel (%p2336_p5) target bundleno = 487 (0x1e7), region = 32  ;;  %s226_s4 = sand.u32 (!%p2336_p5), 1, %s1724_s19  }
  0x84   : > { %s1138_s24 = sshll.u32 (!%p2336_p5), %s226_s4, 6  ;;  %s227_s5 = scalar_lea.sflag (!%p2336_p5), [#allocation3], %s226_s4 }
  0x85   : > { %s2073_s23 = scalar_lea.vmem (!%p2336_p5), [#allocation2], %s1138_s24  ;;  %p2337_p0 = scmp.ne.s32.totalorder (!%p2336_p5), %s2321_s27, 0 }
  0x8a   : > { %1683 = dma.done.wait (%p2337_p0), %s227_s5, 1024  }
  0x8b   : > { %1685 = vsyncadd (%p2337_p0), %s227_s5, 4294966272  ;;  %s2338_s10 = sld [smem:[#allocation19_spill]]  ;;  %s235_s9 = sand.u32 1, %s1929_s21  }
  0x8c   : > { %s237_s1 = sand.u32 1, %s1712_s16   ;;  %s236_s3 = scalar_lea.sflag [#allocation6], %s235_s9 }
  0x8d   : > { %s1139_s11 = sshll.u32 %s237_s1, 8 }
  0x8e   : > { %s2081_s6 = scalar_lea.vmem [#allocation5], %s1139_s11 }
  0x91   : > { %p2339_p4 = scmp.ne.s32.totalorder %s2338_s10, 0 }
  0x93   : > { %1687 = dma.done.wait (%p2339_p4), %s236_s3, 8192  }
  0x94   : > { %1689 = vsyncadd (%p2339_p4), %s236_s3, 4294959104  ;;  %v1368_v0 = vld [vmem:[%s2081_s6 + $0x4] ss:$8 sps:$4 sm:$0xff]   ;;  %v1370_v1 = vld [vmem:[%s2081_s6] ss:$8 sps:$4 sm:$0xff]   ;;  %s2092_s21 = scalar_lea.vmem [#allocation7], %s1139_s11 }
  0x95   : > { %526 = vmatprep.subr.bf16.mxu0 %v1368_v0  ;;  %v1371_v2 = vld [vmem:[%s2081_s6 + $0x14] ss:$8 sps:$4 sm:$0xff]   ;;  %v1373_v3 = vld [vmem:[%s2081_s6 + $0x10] ss:$8 sps:$4 sm:$0xff]   ;;  %v1374_v4 = vld [vmem:[%s2081_s6 + $0x24] ss:$8 sps:$4 sm:$0xff]  }
  0x96   : > { %527 = vmatpush1.bf16.msra.mxu0 %v1370_v1  ;;  %v1380_v5 = vld [vmem:[%s2092_s21 + $0x4] ss:$8 sps:$4 sm:$0xff]   ;;  %v1382_v6 = vld [vmem:[%s2092_s21] ss:$8 sps:$4 sm:$0xff]   ;;  %v1377_v8 = vld [vmem:[%s2081_s6 + $0x34] ss:$8 sps:$4 sm:$0xff]  }
  0x97   : > { %528 = vmatprep.subr.bf16.mxu0 %v1371_v2  ;;  %v1376_v7 = vld [vmem:[%s2081_s6 + $0x20] ss:$8 sps:$4 sm:$0xff]   ;;  %791 = vmatprep.subr.bf16.mxu1 %v1380_v5  ;;  %v1386_v9 = vld [vmem:[%s2092_s21 + $0x14] ss:$8 sps:$4 sm:$0xff]   ;;  %v1388_v10 = vld [vmem:[%s2092_s21 + $0x10] ss:$8 sps:$4 sm:$0xff]  }
  0x98   : > { %792 = vmatpush1.bf16.msra.mxu1 %v1382_v6  ;;  %v1379_v11 = vld [vmem:[%s2081_s6 + $0x30] ss:$8 sps:$4 sm:$0xff]   ;;  %v1392_v12 = vld [vmem:[%s2092_s21 + $0x24] ss:$8 sps:$4 sm:$0xff]   ;;  %v1394_v14 = vld [vmem:[%s2092_s21 + $0x20] ss:$8 sps:$4 sm:$0xff]  }
  0x99   : > { %793 = vmatprep.subr.bf16.mxu1 %v1386_v9  ;;  %v1383_v13 = vld [vmem:[%s2081_s6 + $0x44] ss:$8 sps:$4 sm:$0xff]   ;;  %v1398_v15 = vld [vmem:[%s2092_s21 + $0x34] ss:$8 sps:$4 sm:$0xff]   ;;  %v1385_v16 = vld [vmem:[%s2081_s6 + $0x40] ss:$8 sps:$4 sm:$0xff]  }
  0x9a   : > { %529 = vmatpush1.bf16.msra.mxu0 %v1373_v3  ;;  %v1389_v17 = vld [vmem:[%s2081_s6 + $0x54] ss:$8 sps:$4 sm:$0xff]   ;;  %v1400_v18 = vld [vmem:[%s2092_s21 + $0x30] ss:$8 sps:$4 sm:$0xff]   ;;  %v1404_v19 = vld [vmem:[%s2092_s21 + $0x44] ss:$8 sps:$4 sm:$0xff]  }
  0x9b   : > { %530 = vmatprep.subr.bf16.mxu0 %v1374_v4  ;;  %v1391_v20 = vld [vmem:[%s2081_s6 + $0x50] ss:$8 sps:$4 sm:$0xff]   ;;  %v1395_v21 = vld [vmem:[%s2081_s6 + $0x64] ss:$8 sps:$4 sm:$0xff]   ;;  %v1406_v22 = vld [vmem:[%s2092_s21 + $0x40] ss:$8 sps:$4 sm:$0xff]  }
  0x9c   : > { %794 = vmatpush1.bf16.msra.mxu1 %v1388_v10  ;;  %v1410_v23 = vld [vmem:[%s2092_s21 + $0x54] ss:$8 sps:$4 sm:$0xff]   ;;  %v1397_v24 = vld [vmem:[%s2081_s6 + $0x60] ss:$8 sps:$4 sm:$0xff]   ;;  %v1412_v26 = vld [vmem:[%s2092_s21 + $0x50] ss:$8 sps:$4 sm:$0xff]  }
  0x9d   : > { %795 = vmatprep.subr.bf16.mxu1 %v1392_v12  ;;  %v1401_v25 = vld [vmem:[%s2081_s6 + $0x74] ss:$8 sps:$4 sm:$0xff]   ;;  %v1416_v27 = vld [vmem:[%s2092_s21 + $0x64] ss:$8 sps:$4 sm:$0xff]   ;;  %v1403_v28 = vld [vmem:[%s2081_s6 + $0x70] ss:$8 sps:$4 sm:$0xff]  }
  0x9e   : > { %531 = vmatpush1.bf16.msra.mxu0 %v1376_v7  ;;  %v1407_v29 = vld [vmem:[%s2081_s6 + $0x84] ss:$8 sps:$4 sm:$0xff]   ;;  %v1418_v30 = vld [vmem:[%s2092_s21 + $0x60] ss:$8 sps:$4 sm:$0xff]   ;;  %v1422_v31 = vld [vmem:[%s2092_s21 + $0x74] ss:$8 sps:$4 sm:$0xff]  }
  0x9f   : > { %532 = vmatprep.subr.bf16.mxu0 %v1377_v8  ;;  %v1409_v32 = vld [vmem:[%s2081_s6 + $0x80] ss:$8 sps:$4 sm:$0xff]   ;;  %v1413_v33 = vld [vmem:[%s2081_s6 + $0x94] ss:$8 sps:$4 sm:$0xff]   ;;  %v1424_v34 = vld [vmem:[%s2092_s21 + $0x70] ss:$8 sps:$4 sm:$0xff]  }
  0xa0   : > { %796 = vmatpush1.bf16.msra.mxu1 %v1394_v14  ;;  %v1428_v35 = vld [vmem:[%s2092_s21 + $0x84] ss:$8 sps:$4 sm:$0xff]   ;;  %v1415_v36 = vld [vmem:[%s2081_s6 + $0x90] ss:$8 sps:$4 sm:$0xff]   ;;  %v1430_v38 = vld [vmem:[%s2092_s21 + $0x80] ss:$8 sps:$4 sm:$0xff]  }
  0xa1   : > { %797 = vmatprep.subr.bf16.mxu1 %v1398_v15  ;;  %v1419_v37 = vld [vmem:[%s2081_s6 + $0xa4] ss:$8 sps:$4 sm:$0xff]   ;;  %v1434_v39 = vld [vmem:[%s2092_s21 + $0x94] ss:$8 sps:$4 sm:$0xff]   ;;  %v1421_v40 = vld [vmem:[%s2081_s6 + $0xa0] ss:$8 sps:$4 sm:$0xff]  }
  0xa2   : > { %533 = vmatpush1.bf16.msra.mxu0 %v1379_v11  ;;  %v1456_v41 = vld [vmem:[%s2073_s23 + $0x4] ss:$8 sps:$4 sm:$0xff]   ;;  %v1425_v42 = vld [vmem:[%s2081_s6 + $0xb4] ss:$8 sps:$4 sm:$0xff]   ;;  %v1436_v43 = vld [vmem:[%s2092_s21 + $0x90] ss:$8 sps:$4 sm:$0xff]  }
  0xa3   : > { %534 = vmatprep.subr.bf16.mxu0 %v1383_v13  ;;  %558 = vmatprep.mubr.bf16.mxu0 %v1456_v41  ;;  %v1440_v44 = vld [vmem:[%s2092_s21 + $0xa4] ss:$8 sps:$4 sm:$0xff]   ;;  %v1427_v45 = vld [vmem:[%s2081_s6 + $0xb0] ss:$8 sps:$4 sm:$0xff]   ;;  %v1442_v47 = vld [vmem:[%s2092_s21 + $0xa0] ss:$8 sps:$4 sm:$0xff]  }
  0xa4   : > { %798 = vmatpush1.bf16.msra.mxu1 %v1400_v18  ;;  %823 = vmatprep.mubr.bf16.mxu1 %v1456_v41  ;;  %v1431_v46 = vld [vmem:[%s2081_s6 + $0xc4] ss:$8 sps:$4 sm:$0xff]   ;;  %v1446_v48 = vld [vmem:[%s2092_s21 + $0xb4] ss:$8 sps:$4 sm:$0xff]   ;;  %v1433_v49 = vld [vmem:[%s2081_s6 + $0xc0] ss:$8 sps:$4 sm:$0xff]  }
  0xa5   : > { %799 = vmatprep.subr.bf16.mxu1 %v1404_v19  ;;  %v1437_v50 = vld [vmem:[%s2081_s6 + $0xd4] ss:$8 sps:$4 sm:$0xff]   ;;  %v1448_v51 = vld [vmem:[%s2092_s21 + $0xb0] ss:$8 sps:$4 sm:$0xff]   ;;  %v1452_v52 = vld [vmem:[%s2092_s21 + $0xc4] ss:$8 sps:$4 sm:$0xff]  }
  0xa6   : > { %535 = vmatpush1.bf16.msra.mxu0 %v1385_v16  ;;  %v1439_v53 = vld [vmem:[%s2081_s6 + $0xd0] ss:$8 sps:$4 sm:$0xff]   ;;  %v1443_v54 = vld [vmem:[%s2081_s6 + $0xe4] ss:$8 sps:$4 sm:$0xff]   ;;  %v1457_v55 = vld [vmem:[%s2092_s21 + $0xc0] ss:$8 sps:$4 sm:$0xff]  }
  0xa7   : > { %536 = vmatprep.subr.bf16.mxu0 %v1389_v17  ;;  %v1458_v56 = vld [vmem:[%s2092_s21 + $0xd4] ss:$8 sps:$4 sm:$0xff]   ;;  %v1445_v57 = vld [vmem:[%s2081_s6 + $0xe0] ss:$8 sps:$4 sm:$0xff]   ;;  %v1460_v59 = vld [vmem:[%s2092_s21 + $0xd0] ss:$8 sps:$4 sm:$0xff]  }
  0xa8   : > { %800 = vmatpush1.bf16.msra.mxu1 %v1406_v22  ;;  %v1449_v58 = vld [vmem:[%s2081_s6 + $0xf4] ss:$8 sps:$4 sm:$0xff]   ;;  %v1461_v60 = vld [vmem:[%s2092_s21 + $0xe4] ss:$8 sps:$4 sm:$0xff]   ;;  %v1451_v61 = vld [vmem:[%s2081_s6 + $0xf0] ss:$8 sps:$4 sm:$0xff]  }
  0xa9   : > { %801 = vmatprep.subr.bf16.mxu1 %v1410_v23  ;;  %v1465_v62 = vld [vmem:[%s2092_s21 + $0xe0] ss:$8 sps:$4 sm:$0xff]   ;;  %v1467_v0 = vld [vmem:[%s2092_s21 + $0xf4] ss:$8 sps:$4 sm:$0xff]   ;;  %v1469_v2 = vld [vmem:[%s2092_s21 + $0xf0] ss:$8 sps:$4 sm:$0xff]  }
  0xaa   : > { %537 = vmatpush1.bf16.msra.mxu0 %v1391_v20  ;;  %v1454_v63 = vld [vmem:[%s2073_s23] ss:$8 sps:$4 sm:$0xff]   ;;  %v1463_v1 = vld [vmem:[%s2073_s23 + $0x14] ss:$8 sps:$4 sm:$0xff]   ;;  %v1466_v3 = vld [vmem:[%s2073_s23 + $0x10] ss:$8 sps:$4 sm:$0xff]  }
  0xab   : > { %538 = vmatprep.subr.bf16.mxu0 %v1395_v21  ;;  %v1470_v4 = vld [vmem:[%s2073_s23 + $0x24] ss:$8 sps:$4 sm:$0xff]   ;;  %v1472_v5 = vld [vmem:[%s2073_s23 + $0x20] ss:$8 sps:$4 sm:$0xff]   ;;  %v1473_v6 = vld [vmem:[%s2073_s23 + $0x34] ss:$8 sps:$4 sm:$0xff]  }
  0xac   : > { %802 = vmatpush1.bf16.msra.mxu1 %v1412_v26  ;;  %v1475_v7 = vld [vmem:[%s2073_s23 + $0x30] ss:$8 sps:$4 sm:$0xff]   ;;  %s278_s27 = sand.u32 1, %s1700_s13   ;;  %s2340_s18 = sld [smem:[#allocation13_spill]] }
  0xad   : > { %803 = vmatprep.subr.bf16.mxu1 %v1416_v27  ;;  %s1141_s28 = sshll.u32 %s278_s27, 7  ;;  %s2341_s8 = sld [smem:[#allocation12_spill]] }
  0xae   : > { %539 = vmatpush1.bf16.msra.mxu0 %v1397_v24  ;;  %s2174_s22 = scalar_lea.vmem [#allocation8], %s1141_s28  ;;  %s2342_s9 = sld [smem:[#allocation22_spill]] }
  0xaf   : > { %540 = vmatprep.subr.bf16.mxu0 %v1401_v25  ;;  %s993_s5 = sshll.u32 %s2174_s22, 4  ;;  %s2210_s11 = scalar_lea.sflag [#allocation4], %s278_s27  ;;  %s2204_s5 = int_to_ptr.vmem [resolvable:$true] %s993_s5 }
  0xb0   : > { %804 = vmatpush1.bf16.msra.mxu1 %v1418_v30  ;;  %s1598_s3 = scalar_lea.vmem %s2204_s5, 2048  ;;  %p2343_p2 = scmp.ne.s32.totalorder %s2327_s15, 0 }
  0xb1   : > { %805 = vmatprep.subr.bf16.mxu1 %v1422_v31  ;;  %p1599_p13 = scmp.ne.s32.totalorder %s2204_s5, %s1598_s3  ;;  %s1756_s6 = smov [#allocation8]  }
  0xb2   : > { %541 = vmatpush1.bf16.msra.mxu0 %v1403_v28  ;;  %s1216_s29 = sshll.u32 %s2340_s18, 1  ;;  %s1602_s21 = sshll.u32 %s1756_s6, 4  ;;  %s1603_s21 = int_to_ptr.vmem [resolvable:$false] %s1602_s21 }
  0xb3   : > { %542 = vmatprep.subr.bf16.mxu0 %v1407_v29  ;;  %s1225_s7 = sshll.u32 %s2341_s8, 5  ;;  %p1600_p6 = pnand %p1599_p13, %p2343_p2 }
  0xb4   : > { %806 = vmatpush1.bf16.msra.mxu1 %v1424_v34  ;;  %s990_s4 = sadd.s32 %s1225_s7, %s1216_s29  ;;  %s1604_s28 = scalar_lea.vmem %s1603_s21, 4096 }
  0xb5   : > { %807 = vmatprep.subr.bf16.mxu1 %v1428_v35  ;;  %s1218_s24 = sshll.u32 %s990_s4, 7  ;;  %p1601_p3 = pneg %p1600_p6 }
  0xb6   : > { %543 = vmatpush1.bf16.msra.mxu0 %v1409_v32  ;;  %s2201_s1 = scalar_lea.hbm %s2342_s9, %s1218_s24  ;;  %p1605_p10 = scmp.lt.s32.totalorder %s2204_s5, %s1603_s21 }
  0xb7   : > { %544 = vmatprep.subr.bf16.mxu0 %v1413_v33  ;;  %p1606_p11 = scmp.lt.s32.totalorder %s1604_s28, %s1598_s3 }
  0xb8   : > { %808 = vmatpush1.bf16.msra.mxu1 %v1430_v38 }
  0xb9   : > { %809 = vmatprep.subr.bf16.mxu1 %v1434_v39  ;;  %p1607_p7 = por %p1606_p11, %p1605_p10 }
  0xba   : > { %545 = vmatpush1.bf16.msra.mxu0 %v1415_v36 }
  0xbb   : > { %546 = vmatprep.subr.bf16.mxu0 %v1419_v37  ;;  %p1608_p9 = pnand %p1607_p7, %p1601_p3 }
  0xbc   : > { %810 = vmatpush1.bf16.msra.mxu1 %v1436_v43 }
  0xbd   : > { %811 = vmatprep.subr.bf16.mxu1 %v1440_v44 }
  0xbe   : > { %547 = vmatpush1.bf16.msra.mxu0 %v1421_v40 }
  0xbf   : > { %548 = vmatprep.subr.bf16.mxu0 %v1425_v42 }
  0xc0   : > { %812 = vmatpush1.bf16.msra.mxu1 %v1442_v47 }
  0xc1   : > { %813 = vmatprep.subr.bf16.mxu1 %v1446_v48 }
  0xc2   : > { %549 = vmatpush1.bf16.msra.mxu0 %v1427_v45 }
  0xc3   : > { %550 = vmatprep.subr.bf16.mxu0 %v1431_v46 }
  0xc4   : > { %814 = vmatpush1.bf16.msra.mxu1 %v1448_v51 }
  0xc5   : > { %815 = vmatprep.subr.bf16.mxu1 %v1452_v52 }
  0xc6   : > { %551 = vmatpush1.bf16.msra.mxu0 %v1433_v49 }
  0xc7   : > { %552 = vmatprep.subr.bf16.mxu0 %v1437_v50 }
  0xc8   : > { %816 = vmatpush1.bf16.msra.mxu1 %v1457_v55 }
  0xc9   : > { %817 = vmatprep.subr.bf16.mxu1 %v1458_v56 }
  0xca   : > { %553 = vmatpush1.bf16.msra.mxu0 %v1439_v53 }
  0xcb   : > { %554 = vmatprep.subr.bf16.mxu0 %v1443_v54 }
  0xcc   : > { %818 = vmatpush1.bf16.msra.mxu1 %v1460_v59 }
  0xcd   : > { %819 = vmatprep.subr.bf16.mxu1 %v1461_v60 }
  0xce   : > { %555 = vmatpush1.bf16.msra.mxu0 %v1445_v57 }
  0xcf   : > { %556 = vmatprep.subr.bf16.mxu0 %v1449_v58 }
  0xd0   : > { %820 = vmatpush1.bf16.msra.mxu1 %v1465_v62 }
  0xd1   : > { %821 = vmatprep.subr.bf16.mxu1 %v1467_v0 }
  0xd2   : > { %557 = vmatpush1.bf16.msra.mxu0 %v1451_v61 }
  0xd4   : > { %822 = vmatpush1.bf16.msra.mxu1 %v1469_v2 }
  0xd5   : > { %559 = vmatmul.mubr.bf16.vlgmr.msra.gmra.mrb[0].mxu0 %v1454_v63 }
  0xd6   : > { %568 = vmatprep.mubr.bf16.mxu0 %v1463_v1 }
  0xd7   : > { %824 = vmatmul.mubr.bf16.vlgmr.msra.gmra.mrb[0].mxu1 %v1454_v63 }
  0xd8   : > { %833 = vmatprep.mubr.bf16.mxu1 %v1463_v1 }
  0xdd   : > { %569 = vmatmul.mubr.bf16.gmra.mrb[4].mxu0 %v1466_v3 }
  0xde   : > { %578 = vmatprep.mubr.bf16.mxu0 %v1470_v4 }
  0xdf   : > { %834 = vmatmul.mubr.bf16.gmra.mrb[4].mxu1 %v1466_v3 }
  0xe0   : > { %843 = vmatprep.mubr.bf16.mxu1 %v1470_v4 }
  0xe5   : > { %579 = vmatmul.mubr.bf16.gmra.mrb[8].mxu0 %v1472_v5 }
  0xe6   : > { %588 = vmatprep.mubr.bf16.mxu0 %v1473_v6 }
  0xe7   : > { %844 = vmatmul.mubr.bf16.gmra.mrb[8].mxu1 %v1472_v5 }
  0xe8   : > { %853 = vmatprep.mubr.bf16.mxu1 %v1473_v6 }
  0xed   : > { %589 = vmatmul.mubr.bf16.gmra.mrb[12].mxu0 %v1475_v7 }
  0xef   : > { %854 = vmatmul.mubr.bf16.gmra.mrb[12].mxu1 %v1475_v7 }
 0x1a8   : > { %v560_v8 = vpop.f32.mrb[0].mxu0 }
 0x1a9   : > { %v880_v9 = vmul.f32 0.70710677, %v560_v8  ;;  %v562_v10 = vpop.f32.mrb[1].mxu0  ;;  %v864_v30 = vmul.f32 0.5, %v560_v8 }
 0x1aa   : > { %v881_v11 = vmul.f32 0.70710677, %v562_v10  ;;  %v564_v12 = vpop.f32.mrb[2].mxu0  ;;  %v825_v16 = vpop.f32.mrb[0].mxu1  ;;  %v865_v34 = vmul.f32 0.5, %v562_v10 }
 0x1ab   : > { %1476 = verf.f32 %v880_v9  ;;  %v882_v13 = vmul.f32 0.70710677, %v564_v12  ;;  %v566_v14 = vpop.f32.mrb[3].mxu0  ;;  %v827_v17 = vpop.f32.mrb[1].mxu1  ;;  %v866_v38 = vmul.f32 0.5, %v564_v12 }
 0x1ac   : > { %1478 = verf.f32 %v881_v11  ;;  %v883_v15 = vmul.f32 0.70710677, %v566_v14  ;;  %v829_v19 = vpop.f32.mrb[2].mxu1  ;;  %v867_v43 = vmul.f32 0.5, %v566_v14 }
 0x1ad   : > { %1480 = verf.f32 %v882_v13  ;;  %v831_v22 = vpop.f32.mrb[3].mxu1 }
 0x1ae   : > { %1482 = verf.f32 %v883_v15 }
 0x1b0   : > { %v570_v18 = vpop.f32.mrb[4].mxu0 }
 0x1b1   : > { %v884_v20 = vmul.f32 0.70710677, %v570_v18  ;;  %v572_v21 = vpop.f32.mrb[5].mxu0  ;;  %v868_v62 = vmul.f32 0.5, %v570_v18 }
 0x1b2   : > { %v885_v23 = vmul.f32 0.70710677, %v572_v21  ;;  %v574_v24 = vpop.f32.mrb[6].mxu0  ;;  %v835_v32 = vpop.f32.mrb[4].mxu1  ;;  %v869_v2 = vmul.f32 0.5, %v572_v21 }
 0x1b3   : > { %1484 = verf.f32 %v884_v20  ;;  %v886_v25 = vmul.f32 0.70710677, %v574_v24  ;;  %v576_v26 = vpop.f32.mrb[7].mxu0  ;;  %v837_v36 = vpop.f32.mrb[5].mxu1  ;;  %v870_v6 = vmul.f32 0.5, %v574_v24 }
 0x1b4   : > { %1486 = verf.f32 %v885_v23  ;;  %v887_v27 = vmul.f32 0.70710677, %v576_v26  ;;  %v839_v42 = vpop.f32.mrb[6].mxu1  ;;  %v871_v11 = vmul.f32 0.5, %v576_v26 }
 0x1b5   : > { %v1477_v28 = vpop.eup %1476  ;;  %1488 = verf.f32 %v886_v25  ;;  %v841_v48 = vpop.f32.mrb[7].mxu1 }
 0x1b6   : > { %v1479_v29 = vpop.eup %1478  ;;  %1490 = verf.f32 %v887_v27  ;;  %v912_v31 = vadd.f32 1.0, %v1477_v28 }
 0x1b7   : > { %v1481_v33 = vpop.eup %1480  ;;  %v913_v35 = vadd.f32 1.0, %v1479_v29 }
 0x1b8   : > { %v1483_v37 = vpop.eup %1482  ;;  %v928_v39 = vmul.f32 %v912_v31, %v864_v30  ;;  %v2164_v40 = vpop.f32.mrb[8].mxu0  ;;  %v914_v41 = vadd.f32 1.0, %v1481_v33 }
 0x1b9   : > { %v929_v44 = vmul.f32 %v913_v35, %v865_v34  ;;  %v888_v45 = vmul.f32 0.70710677, %v2164_v40  ;;  %v2167_v46 = vpop.f32.mrb[9].mxu0  ;;  %v915_v47 = vadd.f32 1.0, %v1483_v37  ;;  %v872_v30 = vmul.f32 0.5, %v2164_v40 }
 0x1ba   : > { %v944_v49 = vmul.f32 %v928_v39, %v825_v16  ;;  %v930_v50 = vmul.f32 %v914_v41, %v866_v38  ;;  %v889_v51 = vmul.f32 0.70710677, %v2167_v46  ;;  %v2170_v52 = vpop.f32.mrb[10].mxu0  ;;  %v845_v0 = vpop.f32.mrb[8].mxu1  ;;  %v873_v33 = vmul.f32 0.5, %v2167_v46 }
 0x1bb   : > { %v945_v53 = vmul.f32 %v929_v44, %v827_v17  ;;  %1492 = verf.f32 %v888_v45  ;;  %v931_v54 = vmul.f32 %v915_v47, %v867_v43  ;;  %v2172_v55 = vpop.f32.mrb[11].mxu0  ;;  %v890_v57 = vmul.f32 0.70710677, %v2170_v52  ;;  %v847_v4 = vpop.f32.mrb[9].mxu1 }
 0x1bc   : > { %960 = vst [vmem:[%s2174_s22] sm:$0xff] %v944_v49  ;;  %v946_v56 = vmul.f32 %v930_v50, %v829_v19  ;;  %1494 = verf.f32 %v889_v51  ;;  %v891_v60 = vmul.f32 0.70710677, %v2172_v55  ;;  %v849_v10 = vpop.f32.mrb[10].mxu1  ;;  %v874_v40 = vmul.f32 0.5, %v2170_v52 }
 0x1bd   : > { %v1485_v58 = vpop.eup %1484  ;;  %961 = vst [vmem:[%s2174_s22 + $0x8] sm:$0xff] %v945_v53  ;;  %v947_v59 = vmul.f32 %v931_v54, %v831_v22  ;;  %1496 = verf.f32 %v890_v57  ;;  %v851_v16 = vpop.f32.mrb[11].mxu1  ;;  %v875_v44 = vmul.f32 0.5, %v2172_v55 }
 0x1be   : > { %v1487_v61 = vpop.eup %1486  ;;  %962 = vst [vmem:[%s2174_s22 + $0x10] sm:$0xff] %v946_v56  ;;  %v916_v63 = vadd.f32 1.0, %v1485_v58  ;;  %1498 = verf.f32 %v891_v60 }
 0x1bf   : > { %v1489_v1 = vpop.eup %1488  ;;  %963 = vst [vmem:[%s2174_s22 + $0x18] sm:$0xff] %v947_v59  ;;  %v917_v3 = vadd.f32 1.0, %v1487_v61 }
 0x1c0   : > { %v1491_v5 = vpop.eup %1490  ;;  %v932_v7 = vmul.f32 %v916_v63, %v868_v62  ;;  %v590_v8 = vpop.f32.mrb[12].mxu0  ;;  %v918_v9 = vadd.f32 1.0, %v1489_v1 }
 0x1c1   : > { %v933_v12 = vmul.f32 %v917_v3, %v869_v2  ;;  %v892_v13 = vmul.f32 0.70710677, %v590_v8  ;;  %v592_v14 = vpop.f32.mrb[13].mxu0  ;;  %v919_v15 = vadd.f32 1.0, %v1491_v5  ;;  %v876_v52 = vmul.f32 0.5, %v590_v8 }
 0x1c2   : > { %v948_v17 = vmul.f32 %v932_v7, %v835_v32  ;;  %v934_v18 = vmul.f32 %v918_v9, %v870_v6  ;;  %v893_v19 = vmul.f32 0.70710677, %v592_v14  ;;  %v594_v20 = vpop.f32.mrb[14].mxu0  ;;  %v855_v32 = vpop.f32.mrb[12].mxu1  ;;  %v877_v55 = vmul.f32 0.5, %v592_v14 }
 0x1c3   : > { %v949_v21 = vmul.f32 %v933_v12, %v837_v36  ;;  %1500 = verf.f32 %v892_v13  ;;  %v935_v22 = vmul.f32 %v919_v15, %v871_v11  ;;  %v596_v23 = vpop.f32.mrb[15].mxu0  ;;  %v894_v25 = vmul.f32 0.70710677, %v594_v20  ;;  %v857_v35 = vpop.f32.mrb[13].mxu1 }
 0x1c4   : > { %964 = vst [vmem:[%s2174_s22 + $0x20] sm:$0xff] %v948_v17  ;;  %v950_v24 = vmul.f32 %v934_v18, %v839_v42  ;;  %1502 = verf.f32 %v893_v19  ;;  %v895_v28 = vmul.f32 0.70710677, %v596_v23  ;;  %v859_v38 = vpop.f32.mrb[14].mxu1  ;;  %v878_v61 = vmul.f32 0.5, %v594_v20 }
 0x1c5   : > { %v1493_v26 = vpop.eup %1492  ;;  %965 = vst [vmem:[%s2174_s22 + $0x28] sm:$0xff] %v949_v21  ;;  %v951_v27 = vmul.f32 %v935_v22, %v841_v48  ;;  %1504 = verf.f32 %v894_v25  ;;  %v861_v43 = vpop.f32.mrb[15].mxu1 }
 0x1c6   : > { %v1495_v29 = vpop.eup %1494  ;;  %966 = vst [vmem:[%s2174_s22 + $0x30] sm:$0xff] %v950_v24  ;;  %v920_v31 = vadd.f32 1.0, %v1493_v26  ;;  %1506 = verf.f32 %v895_v28 }
 0x1c7   : > { %967 = vst [vmem:[%s2174_s22 + $0x38] sm:$0xff] %v951_v27  ;;  %v921_v34 = vadd.f32 1.0, %v1495_v29  ;;  %v1497_v36 = vpop.eup %1496 }
 0x1c8   : > { %v936_v37 = vmul.f32 %v920_v31, %v872_v30  ;;  %v1499_v39 = vpop.eup %1498  ;;  %v922_v42 = vadd.f32 1.0, %v1497_v36 }
 0x1c9   : > { %v937_v41 = vmul.f32 %v921_v34, %v873_v33  ;;  %v923_v46 = vadd.f32 1.0, %v1499_v39 }
 0x1ca   : > { %v952_v45 = vmul.f32 %v936_v37, %v845_v0  ;;  %v938_v48 = vmul.f32 %v922_v42, %v874_v40  ;;  %v879_v0 = vmul.f32 0.5, %v596_v23 }
 0x1cb   : > { %v953_v47 = vmul.f32 %v937_v41, %v847_v4  ;;  %v939_v49 = vmul.f32 %v923_v46, %v875_v44 }
 0x1cc   : > { %968 = vst [vmem:[%s2174_s22 + $0x40] sm:$0xff] %v952_v45  ;;  %v954_v51 = vmul.f32 %v938_v48, %v849_v10 }
 0x1cd   : > { %v1501_v50 = vpop.eup %1500  ;;  %969 = vst [vmem:[%s2174_s22 + $0x48] sm:$0xff] %v953_v47  ;;  %v955_v54 = vmul.f32 %v939_v49, %v851_v16 }
 0x1ce   : > { %v1503_v53 = vpop.eup %1502  ;;  %v924_v56 = vadd.f32 1.0, %v1501_v50  ;;  %970 = vst [vmem:[%s2174_s22 + $0x50] sm:$0xff] %v954_v51 }
 0x1cf   : > { %v925_v57 = vadd.f32 1.0, %v1503_v53  ;;  %v1505_v58 = vpop.eup %1504  ;;  %971 = vst [vmem:[%s2174_s22 + $0x58] sm:$0xff] %v955_v54 }
 0x1d0   : > { %v940_v59 = vmul.f32 %v924_v56, %v876_v52  ;;  %v1507_v60 = vpop.eup %1506  ;;  %v926_v63 = vadd.f32 1.0, %v1505_v58 }
 0x1d1   : > { %v941_v62 = vmul.f32 %v925_v57, %v877_v55  ;;  %v927_v1 = vadd.f32 1.0, %v1507_v60 }
 0x1d2   : > { %v956_v2 = vmul.f32 %v940_v59, %v855_v32  ;;  %v942_v4 = vmul.f32 %v926_v63, %v878_v61 }
 0x1d3   : > { %v957_v3 = vmul.f32 %v941_v62, %v857_v35  ;;  %v943_v5 = vmul.f32 %v927_v1, %v879_v0 }
 0x1d4   : > { %972 = vst [vmem:[%s2174_s22 + $0x60] sm:$0xff] %v956_v2  ;;  %v958_v6 = vmul.f32 %v942_v4, %v859_v38 }
 0x1d5   : > { %973 = vst [vmem:[%s2174_s22 + $0x68] sm:$0xff] %v957_v3  ;;  %v959_v7 = vmul.f32 %v943_v5, %v861_v43 }
 0x1d6   : > { %974 = vst [vmem:[%s2174_s22 + $0x70] sm:$0xff] %v958_v6 }
 0x1d7   : > { %975 = vst [vmem:[%s2174_s22 + $0x78] sm:$0xff] %v959_v7 }
 0x1d8   : > { %1611 = shalt.err (!%p1608_p9)
}
 0x1d9   : > { %s1612_s27 = scalar_lea.hbm %s2201_s1, 2048  ;;  %s1616_s8 = scalar_lea.hbm %s2342_s9, 8192 }
 0x1da   : > { %p1613_p12 = scmp.ne.s32.totalorder %s2201_s1, %s1612_s27  ;;  %p1617_p5 = scmp.lt.u32.totalorder %s2201_s1, %s2342_s9 }
 0x1db   : > { %p1618_p0 = scmp.lt.u32.totalorder %s1616_s8, %s1612_s27  ;;  %p1620_p13 = scmp.lt.u32.totalorder %s1612_s27, %s2201_s1 }
 0x1dc   : > { %p1614_p1 = pnand %p1613_p12, %p2343_p2 }
 0x1dd   : > { %p1619_p4 = por %p1618_p0, %p1617_p5 }
 0x1de   : > { %p1615_p8 = pneg %p1614_p1 }
 0x1df   : > { %p1621_p6 = por %p1620_p13, %p1619_p4 }
 0x1e1   : > { %p1622_p3 = pnand %p1621_p6, %p1615_p8 }
 0x1e3   : > { %1625 = shalt.err (!%p1622_p3)
}
 0x1e4   : > { %s1757_s4 = smov 256   ;;  %s1758_s24 = smov 512  }
 0x1e5   : > { %s1759_s23 = smov 16  }
 0x1e6   : > { %1232 = dma.vmem_to_hbm [thread:$0]  (%p2343_p2), %s2204_s5, 2048, %s2201_s1, %s2210_s11, %s1757_s4, %s1758_s24, %s1759_s23  }
 0x1e7 PF: > { %p1249_p10 = scmp.ge.s32.totalorder %s1748_s25, 2  ;;  %s1008_s10 = sand.u32 1, %s1696_s12  }
 0x1e8   : > { %p2344_p11 = scmp.ne.s32.totalorder %s2328_s30, 0  ;;  %s1009_s3 = scalar_lea.sflag [#allocation4], %s1008_s10 }
 0x1ea   : > { %p1245_p7 = pnand %p1249_p10, %p2344_p11 }
 0x1ec   : > { %1691 = dma.done.wait (!%p1245_p7), %s1009_s3, 2048  }
 0x1ed   : > { %1693 = vsyncadd (!%p1245_p7), %s1009_s3, 4294965248  ;;  %s22_s25 = sadd.s32 1, %s1748_s25   ;;  %s2346_s5 = sld [smem:[#allocation20_spill]] }
 0x1ee   : > { %p2239_p9 = scmp.ge.s32.totalorder %s22_s25, 6   ;;  %s2347_s1 = sld [smem:[#allocation18_spill]] }
 0x1ef   : > { %s2348_s21 = sld [smem:[#allocation14_spill]]  ;;  %s2349_s22 = sld [smem:[#allocation15_spill]] }
 0x1f0   : > { %s2350_s23 = sld [smem:[#allocation16_spill]]  ;;  %s2351_s24 = sld [smem:[#allocation17_spill]] }
 0x1f1   : > { %s2352_s12 = smov %s1700_s13  ;;  %s2353_s13 = smov %s1704_s14 }
 0x1f2   : > { %s2354_s14 = smov %s1982_s26  ;;  %s2355_s15 = smov %s1712_s16 }
 0x1f3   : > { %s2356_s16 = smov %s1716_s17  ;;  %s2357_s17 = smov %s2346_s5 }
 0x1f4   : > { %s2358_s18 = smov %s1724_s19  ;;  %s2359_s19 = smov %s1728_s20 }
 0x1f5   : > { %s2360_s20 = smov %s2347_s1  ;;  %21 = sbr.rel (!%p2239_p9) target bundleno = 15 (0xf), region = 101 }
 0x1fc   :  { %1014 = vsyncpa [#allocation3], 1 }
 0x1fd   :  { %1016 = vsyncpa [#allocation3 + $0x1], 1 }
 0x1fe   :  { %1017 = vsyncpa [#allocation6], 1 }
 0x1ff   :  { %1019 = vsyncpa [#allocation6 + $0x1], 1 }
 0x200   :  { %1020 = vsyncpa [#allocation4], 1 }
 0x201   :  { %1022 = vsyncpa [#allocation4 + $0x1], 1 }

</bundles_post_ra>
